<compile_context>
chip_gen: v7x
topology: tpu7x:2x2x1
jax: 0.10.0
libtpu: 0.0.40
codegen_flags: <defaults>
</compile_context>

<pallas_src>
import jax
import jax.numpy as jnp
from jax import lax
from jax.experimental import pallas as pl
from jax.experimental.pallas import tpu as pltpu


def _round_up(n: int, m: int) -> int:
    return ((n + m - 1) // m) * m


def block_kernel(x_ref, gamma_ref, beta_ref, w_ref, b_ref, o_ref):
    # x_ref:     (TR, H)      tile of input rows
    # gamma_ref: (1, H)       LayerNorm weight
    # beta_ref:  (1, H)       LayerNorm bias
    # w_ref:     (H_out, H_in) torch Linear weight, NOT transposed
    # b_ref:     (1, H)       Linear bias
    x = x_ref[...].astype(jnp.float32)

    # --- LayerNorm over last axis (eps = 1e-5, PyTorch default), f32 on VPU ---
    mean = jnp.mean(x, axis=-1, keepdims=True)
    xc = x - mean
    var = jnp.mean(xc * xc, axis=-1, keepdims=True)
    inv = lax.rsqrt(var + 1e-5)
    xn = xc * inv
    xn = xn * gamma_ref[...].astype(jnp.float32) + beta_ref[...].astype(jnp.float32)

    # --- Linear: xn @ W^T + b on the MXU.  Contract xn axis 1 with W axis 1,
    #     so no transposed copy of W is ever materialized.  MXU operand dtype
    #     follows the weight dtype (f32 or bf16); accumulation is f32.
    h = lax.dot_general(
        xn.astype(w_ref.dtype), w_ref[...],
        dimension_numbers=(((1,), (1,)), ((), ())),
        preferred_element_type=jnp.float32)
    h = h + b_ref[...].astype(jnp.float32)

    # --- exact GELU (erf form, matching nn.GELU() default) ---
    g = 0.5 * h * (1.0 + lax.erf(h * jnp.float32(0.7071067811865476)))

    # --- residual ---
    o_ref[...] = (x + g).astype(o_ref.dtype)


def block_forward(x, gamma, beta, weight, bias, *, row_tile=256, mxu_dtype=None):
    """x: (..., H) float32. weight: (H, H) in torch Linear layout (out, in).

    mxu_dtype: optional dtype (e.g. jnp.bfloat16) for the MXU operands only;
    None keeps exact f32 matmul semantics.
    """
    orig_shape = x.shape
    H = orig_shape[-1]
    R = 1
    for d in orig_shape[:-1]:
        R *= d
    x2 = x.reshape(R, H)

    w = weight if mxu_dtype is None else weight.astype(mxu_dtype)
    gamma2 = gamma.reshape(1, H)
    beta2 = beta.reshape(1, H)
    bias2 = bias.reshape(1, H)

    # Row tile: multiple of 8 (sublane), no larger than the (padded) row count.
    # Rows are zero-padded up to a tile multiple and sliced off afterwards
    # (LayerNorm of an all-zero row is finite, so padding is harmless).
    tr = max(8, _round_up(min(row_tile, R), 8))
    R_pad = _round_up(R, tr)
    if R_pad != R:
        x2 = jnp.pad(x2, ((0, R_pad - R), (0, 0)))
    grid = (R_pad // tr,)

    # VMEM budget: double-buffered x / out tiles + single-buffered weight
    # + small params, with headroom; capped at 56 MiB (safe on v7x's 64 MiB).
    itemsize = jnp.dtype(x.dtype).itemsize
    tile_bytes = tr * H * itemsize
    w_bytes = H * H * jnp.dtype(w.dtype).itemsize
    vmem_needed = 2 * 2 * tile_bytes + w_bytes + 8 * H * 4
    vmem_limit = int(min(max(int(vmem_needed * 1.5), 32 << 20), 56 << 20))

    out = pl.pallas_call(
        block_kernel,
        out_shape=jax.ShapeDtypeStruct((R_pad, H), x.dtype),
        grid_spec=pltpu.PrefetchScalarGridSpec(
            num_scalar_prefetch=0,
            grid=grid,
            in_specs=[
                pl.BlockSpec((tr, H), lambda i: (i, 0)),    # x rows
                pl.BlockSpec((1, H), lambda i: (0, 0)),     # gamma
                pl.BlockSpec((1, H), lambda i: (0, 0)),     # beta
                # Weight is grid-invariant: single-buffer to halve its VMEM use.
                pl.BlockSpec((H, H), lambda i: (0, 0),
                             pipeline_mode=pl.Buffered(1)),
                pl.BlockSpec((1, H), lambda i: (0, 0)),     # bias
            ],
            out_specs=pl.BlockSpec((tr, H), lambda i: (i, 0)),
        ),
        compiler_params=pltpu.CompilerParams(
            dimension_semantics=("parallel",),
            vmem_limit_bytes=vmem_limit),
    )(x2, gamma2, beta2, w, bias2)

    if R_pad != R:
        out = out[:R]
    return out.reshape(orig_shape)


if __name__ == "__main__":
    H = 32
    key = jax.random.PRNGKey(0)
    kx, kw, kb, kx2 = jax.random.split(key, 4)

    # Parameters (shapes from Block.__init__):
    # nn.LayerNorm(H): weight=ones(H), bias=zeros(H)
    gamma = jnp.ones((H,), dtype=jnp.float32)
    beta = jnp.zeros((H,), dtype=jnp.float32)
    # nn.Linear(H, H): weight (H, H), bias (H,)
    bound = 1.0 / jnp.sqrt(H)
    weight = jax.random.uniform(kw, (H, H), minval=-bound, maxval=bound,
                                dtype=jnp.float32)
    bias = jax.random.uniform(kb, (H,), minval=-bound, maxval=bound,
                              dtype=jnp.float32)

    def ref(x):
        mean = jnp.mean(x, axis=-1, keepdims=True)
        var = jnp.mean((x - mean) ** 2, axis=-1, keepdims=True)
        xn = (x - mean) / jnp.sqrt(var + 1e-5) * gamma + beta
        h = xn @ weight.T + bias
        g = 0.5 * h * (1.0 + lax.erf(h / jnp.sqrt(2.0)))
        return x + g

    # Case 1: nominal small shape (batch=2, seq=8, hidden=32).
    x = jax.random.normal(kx, (2, 8, H), dtype=jnp.float32)
    y = block_forward(x, gamma, beta, weight, bias)
    jax.block_until_ready(y)
    assert jnp.allclose(y, ref(x), atol=1e-5, rtol=1e-5), "mismatch vs reference"

    # Case 2: row count not a tile multiple (exercises the padded-grid path).
    x_odd = jax.random.normal(kx2, (3, 5, H), dtype=jnp.float32)
    y_odd = block_forward(x_odd, gamma, beta, weight, bias)
    jax.block_until_ready(y_odd)
    assert jnp.allclose(y_odd, ref(x_odd), atol=1e-5, rtol=1e-5), \
        "mismatch vs reference (padded path)"

    print("KERNEL_OK")
</pallas_src>

<mosaic_0001>
module attributes {stable_mosaic.version = 11 : i64} {
  func.func @block_kernel(%arg0: i32, %arg1: memref<16x32xf32, #tpu.memory_space<vmem>>, %arg2: memref<1x32xf32, #tpu.memory_space<vmem>>, %arg3: memref<1x32xf32, #tpu.memory_space<vmem>>, %arg4: memref<32x32xf32, #tpu.memory_space<vmem>>, %arg5: memref<1x32xf32, #tpu.memory_space<vmem>>, %arg6: memref<16x32xf32, #tpu.memory_space<vmem>>) attributes {dimension_semantics = [#tpu.dimension_semantics<parallel>], iteration_bounds = array<i64: 1>, scalar_prefetch = 0 : i64, scratch_operands = 0 : i64, tpu.core_type = #tpu.core_type<tc>, window_params = [{transform_indices = @transform_0, window_bounds = array<i64: 16, 32>}, {pipeline_mode = #tpu.pipeline_mode<synchronous>, transform_indices = @transform_1, window_bounds = array<i64: 1, 32>}, {pipeline_mode = #tpu.pipeline_mode<synchronous>, transform_indices = @transform_2, window_bounds = array<i64: 1, 32>}, {pipeline_mode = #tpu.pipeline_mode<synchronous>, transform_indices = @transform_3, window_bounds = array<i64: 32, 32>}, {pipeline_mode = #tpu.pipeline_mode<synchronous>, transform_indices = @transform_4, window_bounds = array<i64: 1, 32>}, {transform_indices = @transform_5, window_bounds = array<i64: 16, 32>}]} {
    %c0 = arith.constant 0 : index
    %c0_0 = arith.constant 0 : index
    %0 = vector.load %arg1[%c0, %c0_0] : memref<16x32xf32, #tpu.memory_space<vmem>>, vector<16x32xf32>
    %cst = arith.constant dense<0.000000e+00> : vector<16xf32>
    %1 = vector.multi_reduction <add>, %0, %cst [1] : vector<16x32xf32> to vector<16xf32>
    %2 = vector.shape_cast %1 : vector<16xf32> to vector<16x1xf32>
    %cst_1 = arith.constant 3.200000e+01 : f32
    %3 = vector.broadcast %cst_1 : f32 to vector<16x1xf32>
    %4 = arith.divf %2, %3 : vector<16x1xf32>
    %5 = vector.broadcast %4 : vector<16x1xf32> to vector<16x32xf32>
    %6 = arith.subf %0, %5 : vector<16x32xf32>
    %7 = arith.mulf %6, %6 : vector<16x32xf32>
    %cst_2 = arith.constant dense<0.000000e+00> : vector<16xf32>
    %8 = vector.multi_reduction <add>, %7, %cst_2 [1] : vector<16x32xf32> to vector<16xf32>
    %9 = vector.shape_cast %8 : vector<16xf32> to vector<16x1xf32>
    %cst_3 = arith.constant 3.200000e+01 : f32
    %10 = vector.broadcast %cst_3 : f32 to vector<16x1xf32>
    %11 = arith.divf %9, %10 : vector<16x1xf32>
    %cst_4 = arith.constant 9.99999974E-6 : f32
    %12 = vector.broadcast %cst_4 : f32 to vector<16x1xf32>
    %13 = arith.addf %11, %12 : vector<16x1xf32>
    %14 = math.rsqrt %13 : vector<16x1xf32>
    %15 = vector.broadcast %14 : vector<16x1xf32> to vector<16x32xf32>
    %16 = arith.mulf %6, %15 : vector<16x32xf32>
    %c0_5 = arith.constant 0 : index
    %c0_6 = arith.constant 0 : index
    %17 = vector.load %arg2[%c0_5, %c0_6] : memref<1x32xf32, #tpu.memory_space<vmem>>, vector<1x32xf32>
    %18 = vector.broadcast %17 : vector<1x32xf32> to vector<16x32xf32>
    %19 = arith.mulf %16, %18 : vector<16x32xf32>
    %c0_7 = arith.constant 0 : index
    %c0_8 = arith.constant 0 : index
    %20 = vector.load %arg3[%c0_7, %c0_8] : memref<1x32xf32, #tpu.memory_space<vmem>>, vector<1x32xf32>
    %21 = vector.broadcast %20 : vector<1x32xf32> to vector<16x32xf32>
    %22 = arith.addf %19, %21 : vector<16x32xf32>
    %c0_9 = arith.constant 0 : index
    %c0_10 = arith.constant 0 : index
    %23 = vector.load %arg4[%c0_9, %c0_10] : memref<32x32xf32, #tpu.memory_space<vmem>>, vector<32x32xf32>
    %cst_11 = arith.constant dense<0.000000e+00> : vector<16x32xf32>
    %24 = tpu.matmul %22, %23, %cst_11 {dimension_numbers = #tpu.dot_dimension_numbers<[1], [1], [0], [0], [0, 0, 1, 0], [], []>} : vector<16x32xf32>, vector<32x32xf32>, vector<16x32xf32> -> vector<16x32xf32>
    %c0_12 = arith.constant 0 : index
    %c0_13 = arith.constant 0 : index
    %25 = vector.load %arg5[%c0_12, %c0_13] : memref<1x32xf32, #tpu.memory_space<vmem>>, vector<1x32xf32>
    %26 = vector.broadcast %25 : vector<1x32xf32> to vector<16x32xf32>
    %27 = arith.addf %24, %26 : vector<16x32xf32>
    %cst_14 = arith.constant 5.000000e-01 : f32
    %28 = vector.broadcast %cst_14 : f32 to vector<16x32xf32>
    %29 = arith.mulf %28, %27 : vector<16x32xf32>
    %cst_15 = arith.constant 0.707106769 : f32
    %30 = vector.broadcast %cst_15 : f32 to vector<16x32xf32>
    %31 = arith.mulf %27, %30 : vector<16x32xf32>
    %32 = math.erf %31 : vector<16x32xf32>
    %cst_16 = arith.constant 1.000000e+00 : f32
    %33 = vector.broadcast %cst_16 : f32 to vector<16x32xf32>
    %34 = arith.addf %33, %32 : vector<16x32xf32>
    %35 = arith.mulf %29, %34 : vector<16x32xf32>
    %36 = arith.addf %0, %35 : vector<16x32xf32>
    %c0_17 = arith.constant 0 : index
    %c0_18 = arith.constant 0 : index
    %37 = vector.load %arg6[%c0_17, %c0_18] : memref<16x32xf32, #tpu.memory_space<vmem>>, vector<16x32xf32>
    tpu.vector_store %arg6[%c0_17, %c0_18], %36 {strides = array<i32>} : memref<16x32xf32, #tpu.memory_space<vmem>>, vector<16x32xf32>,
    return
  }
  func.func @transform_0(%arg0: i32) -> (i32, i32) {
    %c0_i32 = arith.constant 0 : i32
    %c0_i32_0 = arith.constant 0 : i32
    return %arg0, %c0_i32 : i32, i32
  }
  func.func @transform_1(%arg0: i32) -> (i32, i32) {
    %c0_i32 = arith.constant 0 : i32
    %c0_i32_0 = arith.constant 0 : i32
    %c0_i32_1 = arith.constant 0 : i32
    return %c0_i32, %c0_i32_0 : i32, i32
  }
  func.func @transform_2(%arg0: i32) -> (i32, i32) {
    %c0_i32 = arith.constant 0 : i32
    %c0_i32_0 = arith.constant 0 : i32
    %c0_i32_1 = arith.constant 0 : i32
    return %c0_i32, %c0_i32_0 : i32, i32
  }
  func.func @transform_3(%arg0: i32) -> (i32, i32) {
    %c0_i32 = arith.constant 0 : i32
    %c0_i32_0 = arith.constant 0 : i32
    %c0_i32_1 = arith.constant 0 : i32
    return %c0_i32, %c0_i32_0 : i32, i32
  }
  func.func @transform_4(%arg0: i32) -> (i32, i32) {
    %c0_i32 = arith.constant 0 : i32
    %c0_i32_0 = arith.constant 0 : i32
    %c0_i32_1 = arith.constant 0 : i32
    return %c0_i32, %c0_i32_0 : i32, i32
  }
  func.func @transform_5(%arg0: i32) -> (i32, i32) {
    %c0_i32 = arith.constant 0 : i32
    %c0_i32_0 = arith.constant 0 : i32
    return %arg0, %c0_i32 : i32, i32
  }
}

</mosaic_0001>

<bundles_post_ra>
// kernel: tpu_custom_call.1
= control target key start
LH: loop header
LB: loop body
LE: loop exit
PB: predicated region body
PF: predicated region fallthrough
CT: control target
= control target key end

     0   :  { %10 = vsyncpa [#allocation3], 0  ;;  %s465_s0 = inlined_call_operand.hbm [shape: f32[16,32], index: 0, kind: input, shape index: {}]   ;;  %s466_s1 = inlined_call_operand.vmem [shape: f32[1,32], index: 1, kind: input, shape index: {}]   ;;  %s467_s2 = inlined_call_operand.vmem [shape: f32[1,32], index: 2, kind: input, shape index: {}]   ;;  %s468_s3 = inlined_call_operand.hbm [shape: f32[32,32], index: 3, kind: input, shape index: {}]   ;;  %s469_s4 = inlined_call_operand.vmem [shape: f32[1,32], index: 4, kind: input, shape index: {}]   ;;  %s470_s5 = inlined_call_operand.hbm [shape: f32[16,32], index: 5, kind: output, shape index: {}]  }
   0x1   :  { %11 = vsyncpa [#allocation6], 0 }
   0x2   :  { %12 = vsyncpa [#allocation4], 0  ;;  %s356_s18 = smov [#allocation2]   ;;  %s284_s22 = scalar_lea.hbm %s465_s0, 256 }
   0x3   :  { %s18_s19 = sshll.u32 %s356_s18, 4  ;;  %p285_p0 = scmp.ne.s32.totalorder %s465_s0, %s284_s22  ;;  %s19_s19 = int_to_ptr.vmem [resolvable:$true] %s18_s19 }
   0x4   :  { %p288_p1 = scmp.lt.u32.totalorder %s284_s22, %s465_s0 }
   0x6   :  { %p290_p2 = pnand %p288_p1, %p285_p0 }
   0x8   :  { %293 = shalt.err (!%p290_p2)
}
   0x9   :  { %s294_s27 = scalar_lea.vmem %s19_s19, 256  ;;  %p299_p4 = scmp.lt.s32.totalorder %s19_s19, %s19_s19 }
   0xa   :  { %p295_p3 = scmp.ne.s32.totalorder %s19_s19, %s294_s27  ;;  %p300_p5 = scmp.lt.s32.totalorder %s294_s27, %s294_s27 }
   0xc   :  { %p301_p6 = por %p300_p5, %p299_p4 }
   0xe   :  { %p302_p7 = pnand %p301_p6, %p295_p3 }
  0x10   :  { %305 = shalt.err (!%p302_p7)
}
  0x11   :  { %s357_s28 = smov 128   ;;  %s358_s29 = smov 8  }
  0x12   :  { %24 = dma.hbm_to_vmem [thread:$0]  %s465_s0, 256, %s19_s19, [#allocation3], %s357_s28, %s357_s28, %s358_s29  }
  0x13   :  { %s359_s7 = smov [#allocation5]   ;;  %s306_s11 = scalar_lea.hbm %s468_s3, 512 }
  0x14   :  { %s34_s8 = sshll.u32 %s359_s7, 4  ;;  %p307_p8 = scmp.ne.s32.totalorder %s468_s3, %s306_s11  ;;  %s35_s8 = int_to_ptr.vmem [resolvable:$true] %s34_s8 }
  0x15   :  { %p310_p9 = scmp.lt.u32.totalorder %s306_s11, %s468_s3 }
  0x17   :  { %p312_p10 = pnand %p310_p9, %p307_p8 }
  0x19   :  { %315 = shalt.err (!%p312_p10)
}
  0x1a   :  { %s316_s16 = scalar_lea.vmem %s35_s8, 512  ;;  %p321_p12 = scmp.lt.s32.totalorder %s35_s8, %s35_s8 }
  0x1b   :  { %p317_p11 = scmp.ne.s32.totalorder %s35_s8, %s316_s16  ;;  %p322_p13 = scmp.lt.s32.totalorder %s316_s16, %s316_s16 }
  0x1d   :  { %p323_p0 = por %p322_p13, %p321_p12 }
  0x1f   :  { %p324_p1 = pnand %p323_p0, %p317_p11 }
  0x21   :  { %327 = shalt.err (!%p324_p1)
}
  0x22   :  { %40 = dma.hbm_to_vmem [thread:$0]  %s468_s3, 512, %s35_s8, [#allocation6], %s357_s28, %s357_s28, %s358_s29  }
  0x23   :  { %350 = dma.done.wait [#allocation3], 256  }
  0x24   :  { %351 = vsyncadd [#allocation3], 4294967040 }
  0x25   :  { %352 = dma.done.wait [#allocation6], 512  }
  0x26   :  { %353 = vsyncadd [#allocation6], 4294966784  ;;  %vm51_vm0 = vcmask 261120   ;;  %v421_v0 = vld [vmem:[#allocation2] sm:$0xff]  ;;  %v423_v1 = vld [vmem:[#allocation2 + $0x8] sm:$0xff] }
  0x27   :  { %v52_v2 = vsel %vm51_vm0, %v421_v0, 0.0  ;;  %v55_v3 = vsel %vm51_vm0, %v423_v1, 0.0  ;;  %v97_v14 = vld [vmem:[#allocation5] sm:$0xff]  ;;  %v98_v15 = vld [vmem:[#allocation5 + $0x8] sm:$0xff]  ;;  %vm260_vm1 = vmpackc.low %vm51_vm0, %vm51_vm0 }
  0x28   :  { %53 = vadd.xlane.f32.xlu0 %v52_v2  ;;  %v259_v16 = vpack.c.bf16 %v98_v15, %v97_v14  ;;  %v99_v17 = vld [vmem:[#allocation5 + $0x10] sm:$0xff]  ;;  %v100_v18 = vld [vmem:[#allocation5 + $0x18] sm:$0xff] }
  0x29   :  { %v265_v19 = vpack.c.bf16 %v100_v18, %v99_v17  ;;  %v233_v27 = vld [vmem:[%s466_s1] ss:$0 sm:$0xff]  ;;  %s360_s1 = smov [#allocation7]  }
  0x2a   :  { %261 = vmatprep.subr.msk.bf16.mxu0 %vm260_vm1, %v259_v16  ;;  %v234_v29 = vld [vmem:[%s467_s2] ss:$0 sm:$0xff]  ;;  %s220_s2 = sshll.u32 %s360_s1, 4  ;;  %s221_s2 = int_to_ptr.vmem [resolvable:$true] %s220_s2 }
  0x2b   :  { %264 = vmatpush3.bf16.xpose.msk.msra.mxu0 %vm260_vm1, %v259_v16  ;;  %v235_v36 = vld [vmem:[%s469_s4] ss:$0 sm:$0xff]  ;;  %s328_s4 = scalar_lea.vmem %s221_s2, 256  ;;  %p333_p3 = scmp.lt.s32.totalorder %s221_s2, %s221_s2 }
  0x2c   :  { %56 = vadd.xlane.f32.xlu0 %v55_v3  ;;  %267 = vmatprep.subr.msk.bf16.mxu0 %vm260_vm1, %v265_v19  ;;  %p329_p2 = scmp.ne.s32.totalorder %s221_s2, %s328_s4  ;;  %p334_p4 = scmp.lt.s32.totalorder %s328_s4, %s328_s4 }
  0x2e   :  { %p335_p5 = por %p334_p4, %p333_p3 }
  0x30   :  { %p336_p6 = pnand %p335_p5, %p329_p2 }
  0x33   :  { %270 = vmatpush3.bf16.xpose.msk.msra.mxu0 %vm260_vm1, %v265_v19 }
  0xb5   :  { %v54_v4 = vpop.xlane.xlu0 %53 }
  0xb6   :  { %v59_v5 = vmul.f32 0.03125, %v54_v4 }
  0xb8   :  { %v61_v6 = vsub.f32 %v421_v0, %v59_v5 }
  0xb9   :  { %v57_v7 = vpop.xlane.xlu0 %56 }
  0xba   :  { %v60_v8 = vmul.f32 0.03125, %v57_v7  ;;  %v63_v9 = vmul.f32 %v61_v6, %v61_v6 }
  0xbc   :  { %v62_v10 = vsub.f32 %v423_v1, %v60_v8  ;;  %v65_v11 = vsel %vm51_vm0, %v63_v9, 0.0 }
  0xbd   :  { %66 = vadd.xlane.f32.xlu1 %v65_v11 }
  0xbe   :  { %v64_v12 = vmul.f32 %v62_v10, %v62_v10 }
  0xc0   :  { %v68_v13 = vsel %vm51_vm0, %v64_v12, 0.0 }
  0xc1   :  { %69 = vadd.xlane.f32.xlu1 %v68_v13 }
 0x14a   :  { %v67_v20 = vpop.xlane.xlu1 %66 }
 0x14b   :  { %v71_v21 = vmul.f32 0.03125, %v67_v20 }
 0x14d   :  { %v73_v22 = vadd.f32 1e-05, %v71_v21 }
 0x14e   :  { %v70_v23 = vpop.xlane.xlu1 %69 }
 0x14f   :  { %276 = vrsqrt.f32 %v73_v22  ;;  %v72_v24 = vmul.f32 0.03125, %v70_v23 }
 0x151   :  { %v74_v25 = vadd.f32 1e-05, %v72_v24 }
 0x153   :  { %278 = vrsqrt.f32 %v74_v25 }
 0x159   :  { %v277_v26 = vpop.eup %276 }
 0x15a   :  { %v77_v28 = vmul.f32 %v277_v26, %v61_v6 }
 0x15c   :  { %v86_v30 = vmul.f32 %v233_v27, %v77_v28 }
 0x15d   :  { %v279_v31 = vpop.eup %278 }
 0x15e   :  { %v78_v32 = vmul.f32 %v279_v31, %v62_v10  ;;  %v95_v33 = vadd.f32 %v234_v29, %v86_v30 }
 0x160   :  { %v87_v34 = vmul.f32 %v233_v27, %v78_v32  ;;  %256 = vmatprep.mubr.msk.f32.mxu0 %vm51_vm0, %v95_v33 }
 0x162   :  { %v96_v35 = vadd.f32 %v234_v29, %v87_v34 }
 0x164   :  { %257 = vmatmul.mubr.msk.f32.vlgmr.msra.gmra.mrb[0].mxu0 %vm51_vm0, %v96_v35 }
 0x237   :  { %v258_v37 = vpop.f32.mrb[0].mxu0 }
 0x238   :  { %v198_v38 = vadd.f32 %v258_v37, %v235_v36  ;;  %v192_v39 = vpop.f32.mrb[1].mxu0 }
 0x239   :  { %v193_v40 = vadd.f32 %v235_v36, %v192_v39 }
 0x23a   :  { %v204_v41 = vmul.f32 0.70710677, %v198_v38  ;;  %v202_v45 = vmul.f32 0.5, %v198_v38 }
 0x23b   :  { %v203_v42 = vmul.f32 0.70710677, %v193_v40  ;;  %v201_v47 = vmul.f32 0.5, %v193_v40 }
 0x23c   :  { %280 = verf.f32 %v204_v41 }
 0x23d   :  { %282 = verf.f32 %v203_v42 }
 0x246   :  { %v281_v43 = vpop.eup %280 }
 0x247   :  { %v283_v44 = vpop.eup %282  ;;  %v208_v46 = vadd.f32 1.0, %v281_v43 }
 0x248   :  { %v207_v48 = vadd.f32 1.0, %v283_v44 }
 0x249   :  { %v210_v49 = vmul.f32 %v208_v46, %v202_v45 }
 0x24a   :  { %v209_v50 = vmul.f32 %v207_v48, %v201_v47 }
 0x24b   :  { %v212_v51 = vadd.f32 %v210_v49, %v423_v1 }
 0x24c   :  { %v211_v52 = vadd.f32 %v209_v50, %v421_v0 }
 0x24d   :  { %214 = vst.msk [vmem:[#allocation7 + $0x8] sm:$0xff] %vm51_vm0, %v212_v51 }
 0x24e   :  { %213 = vst.msk [vmem:[#allocation7] sm:$0xff] %vm51_vm0, %v211_v52 }
 0x24f   :  { %339 = shalt.err (!%p336_p6)
}
 0x250   :  { %s340_s25 = scalar_lea.hbm %s470_s5, 256 }
 0x251   :  { %p341_p7 = scmp.ne.s32.totalorder %s470_s5, %s340_s25  ;;  %p344_p8 = scmp.lt.u32.totalorder %s340_s25, %s470_s5 }
 0x253   :  { %p346_p9 = pnand %p344_p8, %p341_p7 }
 0x255   :  { %349 = shalt.err (!%p346_p9)
}
 0x256   :  { %226 = dma.vmem_to_hbm [thread:$0]  %s221_s2, 256, %s470_s5, [#allocation4], %s357_s28, %s357_s28, %s358_s29  }
 0x257   :  { %354 = dma.done.wait [#allocation4], 256  }
 0x258   :  { %355 = vsyncadd [#allocation4], 4294967040 }
 0x259   :  { %230 = vsyncpa [#allocation3], 1 }
 0x25a   :  { %231 = vsyncpa [#allocation6], 1 }
 0x25b   :  { %232 = vsyncpa [#allocation4], 1 }

</bundles_post_ra>
